<compile_context>
chip_gen: v7x
topology: tpu7x:2x2x1
jax: 0.10.0
libtpu: 0.0.40
codegen_flags: <defaults>
</compile_context>

<pallas_src>
import jax
import jax.numpy as jnp
from jax.experimental import pallas as pl
from jax.experimental.pallas import tpu as pltpu

IN_DIM = 360
HID = 256
OUT_DIM = 42

IN_PAD = 384    # 360 padded up to a multiple of 128 (clean lane layout, full MXU K pass)
OUT_PAD = 128   # 42 padded up to 128 (lane-dense, unmasked output stores)


def _round_up(n, m):
    return (n + m - 1) // m * m


def _sigmoid_f32(h):
    # tanh-based sigmoid: transcendental goes to the EUP, no exact divide on the VALU.
    return 0.5 * (jnp.tanh(0.5 * h) + 1.0)


def _mlp_kernel(x_ref,
                w1_ref, b1_ref,
                w2_ref, b2_ref,
                w3_ref, b3_ref,
                w4_ref, b4_ref,
                w5_ref, b5_ref,
                o_ref):
    # All matmuls: bf16 operands on the MXU, f32 accumulation.
    h = jnp.dot(x_ref[...], w1_ref[...],
                preferred_element_type=jnp.float32) + b1_ref[...]
    h = _sigmoid_f32(h)

    h = jnp.dot(h.astype(jnp.bfloat16), w2_ref[...],
                preferred_element_type=jnp.float32) + b2_ref[...]
    h = _sigmoid_f32(h)

    h = jnp.dot(h.astype(jnp.bfloat16), w3_ref[...],
                preferred_element_type=jnp.float32) + b3_ref[...]
    h = _sigmoid_f32(h)

    h = jnp.dot(h.astype(jnp.bfloat16), w4_ref[...],
                preferred_element_type=jnp.float32) + b4_ref[...]
    h = _sigmoid_f32(h)

    out = jnp.dot(h.astype(jnp.bfloat16), w5_ref[...],
                  preferred_element_type=jnp.float32) + b5_ref[...]
    o_ref[...] = out.astype(o_ref.dtype)


def _prepare_weight_operands(params):
    """Pad + cast weights once: W -> bf16 (in, out), b -> f32 (1, out)."""
    w1, b1 = params["fc1"]
    w2, b2 = params["fc2"]
    w3, b3 = params["fc3"]
    w4, b4 = params["fc4"]
    w5, b5 = params["fc5"]

    w1p = jnp.pad(w1, ((0, IN_PAD - IN_DIM), (0, 0))).astype(jnp.bfloat16)
    w5p = jnp.pad(w5, ((0, 0), (0, OUT_PAD - OUT_DIM))).astype(jnp.bfloat16)
    b5p = jnp.pad(b5, (0, OUT_PAD - OUT_DIM)).astype(jnp.float32).reshape(1, OUT_PAD)

    return [
        w1p, b1.astype(jnp.float32).reshape(1, HID),
        w2.astype(jnp.bfloat16), b2.astype(jnp.float32).reshape(1, HID),
        w3.astype(jnp.bfloat16), b3.astype(jnp.float32).reshape(1, HID),
        w4.astype(jnp.bfloat16), b4.astype(jnp.float32).reshape(1, HID),
        w5p, b5p,
    ]


def transfer_learn1_forward(x, params, max_tile_b=256):
    """x: (B, 360) float32. params: dict of (W_t, b), W_t is (in, out)."""
    B = x.shape[0]

    # Batch tiling: large tiles fill the MXU M dim and amortize per-step cost;
    # for small B just round up to a sublane multiple and run a single step.
    if B <= max_tile_b:
        tile_b = _round_up(max(B, 1), 8)
        n_tiles = 1
    else:
        tile_b = max_tile_b
        n_tiles = pl.cdiv(B, tile_b)
    b_pad = tile_b * n_tiles

    # Zero-pad batch rows and the K dim (360 -> 384); cast activations to bf16.
    x_p = jnp.pad(x, ((0, b_pad - B), (0, IN_PAD - IN_DIM))).astype(jnp.bfloat16)

    weight_ops = _prepare_weight_operands(params)

    const_map = lambda i: (0, 0)          # weights/biases: VMEM-resident, DMA'd once
    in_specs = [pl.BlockSpec((tile_b, IN_PAD), lambda i: (i, 0))]
    in_specs += [pl.BlockSpec(op.shape, const_map) for op in weight_ops]

    flops = 2 * b_pad * (IN_PAD * HID + 3 * HID * HID + HID * OUT_PAD)
    transcendentals = 4 * b_pad * HID
    bytes_accessed = (x_p.size * x_p.dtype.itemsize
                      + b_pad * OUT_PAD * 4
                      + sum(int(op.size) * op.dtype.itemsize for op in weight_ops))

    out = pl.pallas_call(
        _mlp_kernel,
        out_shape=jax.ShapeDtypeStruct((b_pad, OUT_PAD), jnp.float32),
        grid=(n_tiles,),
        in_specs=in_specs,
        out_specs=pl.BlockSpec((tile_b, OUT_PAD), lambda i: (i, 0)),
        compiler_params=pltpu.CompilerParams(
            dimension_semantics=("parallel",)),
        cost_estimate=pl.CostEstimate(
            flops=flops,
            transcendentals=transcendentals,
            bytes_accessed=bytes_accessed),
    )(x_p, *weight_ops)

    # Slice off batch padding and the padded (zero-weight) output lanes.
    return out[:B, :OUT_DIM]


def init_params(key):
    """Deterministic PyTorch-style init (uniform(-1/sqrt(fan_in), +1/sqrt(fan_in)))."""
    dims = [(IN_DIM, HID), (HID, HID), (HID, HID), (HID, HID), (HID, OUT_DIM)]
    names = ("fc1", "fc2", "fc3", "fc4", "fc5")
    params = {}
    for name, (fan_in, fan_out) in zip(names, dims):
        key, kw, kb = jax.random.split(key, 3)
        bound = 1.0 / (fan_in ** 0.5)
        # stored pre-transposed: (in_features, out_features)
        w_t = jax.random.uniform(kw, (fan_in, fan_out), jnp.float32, -bound, bound)
        b = jax.random.uniform(kb, (fan_out,), jnp.float32, -bound, bound)
        params[name] = (w_t, b)
    return params


def reference_forward(x, params):
    h = x
    for name in ("fc1", "fc2", "fc3", "fc4"):
        w_t, b = params[name]
        h = jax.nn.sigmoid(h @ w_t + b)
    w_t, b = params["fc5"]
    return h @ w_t + b  # no softmax (it was sliced off by [:-1])


if __name__ == "__main__":
    key = jax.random.PRNGKey(0)
    key, kx = jax.random.split(key)
    B = 8
    x = jax.random.normal(kx, (B, IN_DIM), jnp.float32)

    params = init_params(key)

    out = transfer_learn1_forward(x, params)
    out = jax.block_until_ready(out)

    ref = reference_forward(x, params)
    assert out.shape == (B, OUT_DIM)
    # bf16 MXU operands (f32 accumulation) -> looser tolerance than pure f32.
    assert jnp.allclose(out, ref, atol=5e-2, rtol=5e-2), "mismatch vs reference"

    print("KERNEL_OK")
</pallas_src>

<mosaic_0001>
module attributes {stable_mosaic.version = 11 : i64} {
  func.func @_mlp_kernel(%arg0: i32, %arg1: memref<8x384xbf16, #tpu.memory_space<vmem>>, %arg2: memref<384x256xbf16, #tpu.memory_space<vmem>>, %arg3: memref<1x256xf32, #tpu.memory_space<vmem>>, %arg4: memref<256x256xbf16, #tpu.memory_space<vmem>>, %arg5: memref<1x256xf32, #tpu.memory_space<vmem>>, %arg6: memref<256x256xbf16, #tpu.memory_space<vmem>>, %arg7: memref<1x256xf32, #tpu.memory_space<vmem>>, %arg8: memref<256x256xbf16, #tpu.memory_space<vmem>>, %arg9: memref<1x256xf32, #tpu.memory_space<vmem>>, %arg10: memref<256x128xbf16, #tpu.memory_space<vmem>>, %arg11: memref<1x128xf32, #tpu.memory_space<vmem>>, %arg12: memref<8x128xf32, #tpu.memory_space<vmem>>) attributes {dimension_semantics = [#tpu.dimension_semantics<parallel>], iteration_bounds = array<i64: 1>, scalar_prefetch = 0 : i64, scratch_operands = 0 : i64, tpu.core_type = #tpu.core_type<tc>, window_params = [{transform_indices = @transform_0, window_bounds = array<i64: 8, 384>}, {pipeline_mode = #tpu.pipeline_mode<synchronous>, transform_indices = @transform_1, window_bounds = array<i64: 384, 256>}, {pipeline_mode = #tpu.pipeline_mode<synchronous>, transform_indices = @transform_2, window_bounds = array<i64: 1, 256>}, {pipeline_mode = #tpu.pipeline_mode<synchronous>, transform_indices = @transform_3, window_bounds = array<i64: 256, 256>}, {pipeline_mode = #tpu.pipeline_mode<synchronous>, transform_indices = @transform_4, window_bounds = array<i64: 1, 256>}, {pipeline_mode = #tpu.pipeline_mode<synchronous>, transform_indices = @transform_5, window_bounds = array<i64: 256, 256>}, {pipeline_mode = #tpu.pipeline_mode<synchronous>, transform_indices = @transform_6, window_bounds = array<i64: 1, 256>}, {pipeline_mode = #tpu.pipeline_mode<synchronous>, transform_indices = @transform_7, window_bounds = array<i64: 256, 256>}, {pipeline_mode = #tpu.pipeline_mode<synchronous>, transform_indices = @transform_8, window_bounds = array<i64: 1, 256>}, {pipeline_mode = #tpu.pipeline_mode<synchronous>, transform_indices = @transform_9, window_bounds = array<i64: 256, 128>}, {pipeline_mode = #tpu.pipeline_mode<synchronous>, transform_indices = @transform_10, window_bounds = array<i64: 1, 128>}, {transform_indices = @transform_11, window_bounds = array<i64: 8, 128>}]} {
    %c0 = arith.constant 0 : index
    %c0_0 = arith.constant 0 : index
    %0 = vector.load %arg1[%c0, %c0_0] : memref<8x384xbf16, #tpu.memory_space<vmem>>, vector<8x384xbf16>
    %c0_1 = arith.constant 0 : index
    %c0_2 = arith.constant 0 : index
    %1 = vector.load %arg2[%c0_1, %c0_2] : memref<384x256xbf16, #tpu.memory_space<vmem>>, vector<384x256xbf16>
    %cst = arith.constant dense<0.000000e+00> : vector<8x256xf32>
    %2 = tpu.matmul %0, %1, %cst {dimension_numbers = #tpu.dot_dimension_numbers<[1], [0], [0], [1], [0, 0, 1, 1], [], []>} : vector<8x384xbf16>, vector<384x256xbf16>, vector<8x256xf32> -> vector<8x256xf32>
    %c0_3 = arith.constant 0 : index
    %c0_4 = arith.constant 0 : index
    %3 = vector.load %arg3[%c0_3, %c0_4] : memref<1x256xf32, #tpu.memory_space<vmem>>, vector<1x256xf32>
    %4 = vector.broadcast %3 : vector<1x256xf32> to vector<8x256xf32>
    %5 = arith.addf %2, %4 : vector<8x256xf32>
    %cst_5 = arith.constant 5.000000e-01 : f32
    %6 = vector.broadcast %cst_5 : f32 to vector<8x256xf32>
    %7 = arith.mulf %6, %5 : vector<8x256xf32>
    %8 = math.tanh %7 : vector<8x256xf32>
    %cst_6 = arith.constant 1.000000e+00 : f32
    %9 = vector.broadcast %cst_6 : f32 to vector<8x256xf32>
    %10 = arith.addf %8, %9 : vector<8x256xf32>
    %cst_7 = arith.constant 5.000000e-01 : f32
    %11 = vector.broadcast %cst_7 : f32 to vector<8x256xf32>
    %12 = arith.mulf %11, %10 : vector<8x256xf32>
    %13 = arith.truncf %12 : vector<8x256xf32> to vector<8x256xbf16>
    %c0_8 = arith.constant 0 : index
    %c0_9 = arith.constant 0 : index
    %14 = vector.load %arg4[%c0_8, %c0_9] : memref<256x256xbf16, #tpu.memory_space<vmem>>, vector<256x256xbf16>
    %cst_10 = arith.constant dense<0.000000e+00> : vector<8x256xf32>
    %15 = tpu.matmul %13, %14, %cst_10 {dimension_numbers = #tpu.dot_dimension_numbers<[1], [0], [0], [1], [0, 0, 1, 1], [], []>} : vector<8x256xbf16>, vector<256x256xbf16>, vector<8x256xf32> -> vector<8x256xf32>
    %c0_11 = arith.constant 0 : index
    %c0_12 = arith.constant 0 : index
    %16 = vector.load %arg5[%c0_11, %c0_12] : memref<1x256xf32, #tpu.memory_space<vmem>>, vector<1x256xf32>
    %17 = vector.broadcast %16 : vector<1x256xf32> to vector<8x256xf32>
    %18 = arith.addf %15, %17 : vector<8x256xf32>
    %cst_13 = arith.constant 5.000000e-01 : f32
    %19 = vector.broadcast %cst_13 : f32 to vector<8x256xf32>
    %20 = arith.mulf %19, %18 : vector<8x256xf32>
    %21 = math.tanh %20 : vector<8x256xf32>
    %cst_14 = arith.constant 1.000000e+00 : f32
    %22 = vector.broadcast %cst_14 : f32 to vector<8x256xf32>
    %23 = arith.addf %21, %22 : vector<8x256xf32>
    %cst_15 = arith.constant 5.000000e-01 : f32
    %24 = vector.broadcast %cst_15 : f32 to vector<8x256xf32>
    %25 = arith.mulf %24, %23 : vector<8x256xf32>
    %26 = arith.truncf %25 : vector<8x256xf32> to vector<8x256xbf16>
    %c0_16 = arith.constant 0 : index
    %c0_17 = arith.constant 0 : index
    %27 = vector.load %arg6[%c0_16, %c0_17] : memref<256x256xbf16, #tpu.memory_space<vmem>>, vector<256x256xbf16>
    %cst_18 = arith.constant dense<0.000000e+00> : vector<8x256xf32>
    %28 = tpu.matmul %26, %27, %cst_18 {dimension_numbers = #tpu.dot_dimension_numbers<[1], [0], [0], [1], [0, 0, 1, 1], [], []>} : vector<8x256xbf16>, vector<256x256xbf16>, vector<8x256xf32> -> vector<8x256xf32>
    %c0_19 = arith.constant 0 : index
    %c0_20 = arith.constant 0 : index
    %29 = vector.load %arg7[%c0_19, %c0_20] : memref<1x256xf32, #tpu.memory_space<vmem>>, vector<1x256xf32>
    %30 = vector.broadcast %29 : vector<1x256xf32> to vector<8x256xf32>
    %31 = arith.addf %28, %30 : vector<8x256xf32>
    %cst_21 = arith.constant 5.000000e-01 : f32
    %32 = vector.broadcast %cst_21 : f32 to vector<8x256xf32>
    %33 = arith.mulf %32, %31 : vector<8x256xf32>
    %34 = math.tanh %33 : vector<8x256xf32>
    %cst_22 = arith.constant 1.000000e+00 : f32
    %35 = vector.broadcast %cst_22 : f32 to vector<8x256xf32>
    %36 = arith.addf %34, %35 : vector<8x256xf32>
    %cst_23 = arith.constant 5.000000e-01 : f32
    %37 = vector.broadcast %cst_23 : f32 to vector<8x256xf32>
    %38 = arith.mulf %37, %36 : vector<8x256xf32>
    %39 = arith.truncf %38 : vector<8x256xf32> to vector<8x256xbf16>
    %c0_24 = arith.constant 0 : index
    %c0_25 = arith.constant 0 : index
    %40 = vector.load %arg8[%c0_24, %c0_25] : memref<256x256xbf16, #tpu.memory_space<vmem>>, vector<256x256xbf16>
    %cst_26 = arith.constant dense<0.000000e+00> : vector<8x256xf32>
    %41 = tpu.matmul %39, %40, %cst_26 {dimension_numbers = #tpu.dot_dimension_numbers<[1], [0], [0], [1], [0, 0, 1, 1], [], []>} : vector<8x256xbf16>, vector<256x256xbf16>, vector<8x256xf32> -> vector<8x256xf32>
    %c0_27 = arith.constant 0 : index
    %c0_28 = arith.constant 0 : index
    %42 = vector.load %arg9[%c0_27, %c0_28] : memref<1x256xf32, #tpu.memory_space<vmem>>, vector<1x256xf32>
    %43 = vector.broadcast %42 : vector<1x256xf32> to vector<8x256xf32>
    %44 = arith.addf %41, %43 : vector<8x256xf32>
    %cst_29 = arith.constant 5.000000e-01 : f32
    %45 = vector.broadcast %cst_29 : f32 to vector<8x256xf32>
    %46 = arith.mulf %45, %44 : vector<8x256xf32>
    %47 = math.tanh %46 : vector<8x256xf32>
    %cst_30 = arith.constant 1.000000e+00 : f32
    %48 = vector.broadcast %cst_30 : f32 to vector<8x256xf32>
    %49 = arith.addf %47, %48 : vector<8x256xf32>
    %cst_31 = arith.constant 5.000000e-01 : f32
    %50 = vector.broadcast %cst_31 : f32 to vector<8x256xf32>
    %51 = arith.mulf %50, %49 : vector<8x256xf32>
    %52 = arith.truncf %51 : vector<8x256xf32> to vector<8x256xbf16>
    %c0_32 = arith.constant 0 : index
    %c0_33 = arith.constant 0 : index
    %53 = vector.load %arg10[%c0_32, %c0_33] : memref<256x128xbf16, #tpu.memory_space<vmem>>, vector<256x128xbf16>
    %cst_34 = arith.constant dense<0.000000e+00> : vector<8x128xf32>
    %54 = tpu.matmul %52, %53, %cst_34 {dimension_numbers = #tpu.dot_dimension_numbers<[1], [0], [0], [1], [0, 0, 1, 1], [], []>} : vector<8x256xbf16>, vector<256x128xbf16>, vector<8x128xf32> -> vector<8x128xf32>
    %c0_35 = arith.constant 0 : index
    %c0_36 = arith.constant 0 : index
    %55 = vector.load %arg11[%c0_35, %c0_36] : memref<1x128xf32, #tpu.memory_space<vmem>>, vector<1x128xf32>
    %56 = vector.broadcast %55 : vector<1x128xf32> to vector<8x128xf32>
    %57 = arith.addf %54, %56 : vector<8x128xf32>
    %c0_37 = arith.constant 0 : index
    %c0_38 = arith.constant 0 : index
    %58 = vector.load %arg12[%c0_37, %c0_38] : memref<8x128xf32, #tpu.memory_space<vmem>>, vector<8x128xf32>
    tpu.vector_store %arg12[%c0_37, %c0_38], %57 {strides = array<i32>} : memref<8x128xf32, #tpu.memory_space<vmem>>, vector<8x128xf32>,
    return
  }
  func.func @transform_0(%arg0: i32) -> (i32, i32) {
    %c0_i32 = arith.constant 0 : i32
    %c0_i32_0 = arith.constant 0 : i32
    return %arg0, %c0_i32 : i32, i32
  }
  func.func @transform_1(%arg0: i32) -> (i32, i32) {
    %c0_i32 = arith.constant 0 : i32
    %c0_i32_0 = arith.constant 0 : i32
    %c0_i32_1 = arith.constant 0 : i32
    return %c0_i32, %c0_i32_0 : i32, i32
  }
  func.func @transform_2(%arg0: i32) -> (i32, i32) {
    %c0_i32 = arith.constant 0 : i32
    %c0_i32_0 = arith.constant 0 : i32
    %c0_i32_1 = arith.constant 0 : i32
    return %c0_i32, %c0_i32_0 : i32, i32
  }
  func.func @transform_3(%arg0: i32) -> (i32, i32) {
    %c0_i32 = arith.constant 0 : i32
    %c0_i32_0 = arith.constant 0 : i32
    %c0_i32_1 = arith.constant 0 : i32
    return %c0_i32, %c0_i32_0 : i32, i32
  }
  func.func @transform_4(%arg0: i32) -> (i32, i32) {
    %c0_i32 = arith.constant 0 : i32
    %c0_i32_0 = arith.constant 0 : i32
    %c0_i32_1 = arith.constant 0 : i32
    return %c0_i32, %c0_i32_0 : i32, i32
  }
  func.func @transform_5(%arg0: i32) -> (i32, i32) {
    %c0_i32 = arith.constant 0 : i32
    %c0_i32_0 = arith.constant 0 : i32
    %c0_i32_1 = arith.constant 0 : i32
    return %c0_i32, %c0_i32_0 : i32, i32
  }
  func.func @transform_6(%arg0: i32) -> (i32, i32) {
    %c0_i32 = arith.constant 0 : i32
    %c0_i32_0 = arith.constant 0 : i32
    %c0_i32_1 = arith.constant 0 : i32
    return %c0_i32, %c0_i32_0 : i32, i32
  }
  func.func @transform_7(%arg0: i32) -> (i32, i32) {
    %c0_i32 = arith.constant 0 : i32
    %c0_i32_0 = arith.constant 0 : i32
    %c0_i32_1 = arith.constant 0 : i32
    return %c0_i32, %c0_i32_0 : i32, i32
  }
  func.func @transform_8(%arg0: i32) -> (i32, i32) {
    %c0_i32 = arith.constant 0 : i32
    %c0_i32_0 = arith.constant 0 : i32
    %c0_i32_1 = arith.constant 0 : i32
    return %c0_i32, %c0_i32_0 : i32, i32
  }
  func.func @transform_9(%arg0: i32) -> (i32, i32) {
    %c0_i32 = arith.constant 0 : i32
    %c0_i32_0 = arith.constant 0 : i32
    %c0_i32_1 = arith.constant 0 : i32
    return %c0_i32, %c0_i32_0 : i32, i32
  }
  func.func @transform_10(%arg0: i32) -> (i32, i32) {
    %c0_i32 = arith.constant 0 : i32
    %c0_i32_0 = arith.constant 0 : i32
    %c0_i32_1 = arith.constant 0 : i32
    return %c0_i32, %c0_i32_0 : i32, i32
  }
  func.func @transform_11(%arg0: i32) -> (i32, i32) {
    %c0_i32 = arith.constant 0 : i32
    %c0_i32_0 = arith.constant 0 : i32
    return %arg0, %c0_i32 : i32, i32
  }
}

</mosaic_0001>

<bundles_post_ra>
// kernel: tpu_custom_call.1
= control target key start
LH: loop header
LB: loop body
LE: loop exit
PB: predicated region body
PF: predicated region fallthrough
CT: control target
= control target key end

     0   :  { %16 = vsyncpa [#allocation3], 0  ;;  %s2304_s0 = inlined_call_operand.hbm [shape: bf16[8,384], index: 0, kind: input, shape index: {}]   ;;  %s2305_s1 = inlined_call_operand.hbm [shape: bf16[384,256], index: 1, kind: input, shape index: {}]   ;;  %s2306_s2 = inlined_call_operand.vmem [shape: f32[1,256], index: 2, kind: input, shape index: {}]   ;;  %s2307_s3 = inlined_call_operand.hbm [shape: bf16[256,256], index: 3, kind: input, shape index: {}]   ;;  %s2308_s4 = inlined_call_operand.vmem [shape: f32[1,256], index: 4, kind: input, shape index: {}]   ;;  %s2309_s5 = inlined_call_operand.hbm [shape: bf16[256,256], index: 5, kind: input, shape index: {}]   ;;  %s2310_s6 = inlined_call_operand.vmem [shape: f32[1,256], index: 6, kind: input, shape index: {}]   ;;  %s2311_s7 = inlined_call_operand.hbm [shape: bf16[256,256], index: 7, kind: input, shape index: {}]   ;;  %s2312_s8 = inlined_call_operand.vmem [shape: f32[1,256], index: 8, kind: input, shape index: {}]   ;;  %s2313_s9 = inlined_call_operand.hbm [shape: bf16[256,128], index: 9, kind: input, shape index: {}]   ;;  %s2314_s10 = inlined_call_operand.vmem [shape: f32[1,128], index: 10, kind: input, shape index: {}]   ;;  %s2315_s11 = inlined_call_operand.hbm [shape: f32[8,128], index: 11, kind: output, shape index: {}]  }
   0x1   :  { %17 = vsyncpa [#allocation6], 0 }
   0x2   :  { %18 = vsyncpa [#allocation9], 0 }
   0x3   :  { %19 = vsyncpa [#allocation12], 0 }
   0x4   :  { %20 = vsyncpa [#allocation4], 0  ;;  %s2103_s17 = smov [#allocation5]   ;;  %s1939_s21 = scalar_lea.hbm %s2305_s1, 6144 }
   0x5   :  { %s36_s18 = sshll.u32 %s2103_s17, 4  ;;  %p1940_p0 = scmp.ne.s32.totalorder %s2305_s1, %s1939_s21  ;;  %s37_s18 = int_to_ptr.vmem [resolvable:$true] %s36_s18 }
   0x6   :  { %p1943_p1 = scmp.lt.u32.totalorder %s1939_s21, %s2305_s1 }
   0x8   :  { %p1945_p2 = pnand %p1943_p1, %p1940_p0 }
   0xa   :  { %1948 = shalt.err (!%p1945_p2)
}
   0xb   :  { %s1949_s26 = scalar_lea.vmem %s37_s18, 6144  ;;  %p1954_p4 = scmp.lt.s32.totalorder %s37_s18, %s37_s18 }
   0xc   :  { %p1950_p3 = scmp.ne.s32.totalorder %s37_s18, %s1949_s26  ;;  %p1955_p5 = scmp.lt.s32.totalorder %s1949_s26, %s1949_s26 }
   0xe   :  { %p1956_p6 = por %p1955_p5, %p1954_p4 }
  0x10   :  { %p1957_p7 = pnand %p1956_p6, %p1950_p3 }
  0x12   :  { %1960 = shalt.err (!%p1957_p7)
}
  0x13   :  { %s2104_s27 = smov 128   ;;  %s2105_s28 = smov 8  }
  0x14   :  { %42 = dma.hbm_to_vmem [thread:$0]  %s2305_s1, 6144, %s37_s18, [#allocation6], %s2104_s27, %s2104_s27, %s2105_s28  }
  0x15   :  { %s2106_s12 = smov [#allocation8]   ;;  %s2107_s14 = smov [#allocation2]  }
  0x16   :  { %s64_s13 = sshll.u32 %s2106_s12, 4  ;;  %s27_s15 = sshll.u32 %s2107_s14, 4  ;;  %s65_s13 = int_to_ptr.vmem [resolvable:$true] %s64_s13  ;;  %s28_s15 = int_to_ptr.vmem [resolvable:$true] %s27_s15 }
  0x17   :  { %s1961_s19 = scalar_lea.hbm %s2309_s5, 4096 }
  0x18   :  { %p1962_p8 = scmp.ne.s32.totalorder %s2309_s5, %s1961_s19  ;;  %p1965_p9 = scmp.lt.u32.totalorder %s1961_s19, %s2309_s5 }
  0x1a   :  { %p1967_p10 = pnand %p1965_p9, %p1962_p8 }
  0x1c   :  { %1970 = shalt.err (!%p1967_p10)
}
  0x1d   :  { %s1971_s1 = scalar_lea.vmem %s65_s13, 4096  ;;  %p1976_p12 = scmp.lt.s32.totalorder %s65_s13, %s65_s13 }
  0x1e   :  { %p1972_p11 = scmp.ne.s32.totalorder %s65_s13, %s1971_s1  ;;  %p1977_p13 = scmp.lt.s32.totalorder %s1971_s1, %s1971_s1 }
  0x20   :  { %p1978_p0 = por %p1977_p13, %p1976_p12 }
  0x22   :  { %p1979_p1 = pnand %p1978_p0, %p1972_p11 }
  0x24   :  { %1982 = shalt.err (!%p1979_p1)
}
  0x25   :  { %70 = dma.hbm_to_vmem [thread:$0]  %s2309_s5, 4096, %s65_s13, [#allocation9], %s2104_s27, %s2104_s27, %s2105_s28  }
  0x26   :  { %s1983_s29 = scalar_lea.hbm %s2304_s0, 192 }
  0x27   :  { %p1984_p2 = scmp.ne.s32.totalorder %s2304_s0, %s1983_s29  ;;  %p1987_p3 = scmp.lt.u32.totalorder %s1983_s29, %s2304_s0 }
  0x29   :  { %p1989_p4 = pnand %p1987_p3, %p1984_p2 }
  0x2b   :  { %1992 = shalt.err (!%p1989_p4)
}
  0x2c   :  { %s1993_s17 = scalar_lea.vmem %s28_s15, 192  ;;  %p1998_p6 = scmp.lt.s32.totalorder %s28_s15, %s28_s15 }
  0x2d   :  { %p1994_p5 = scmp.ne.s32.totalorder %s28_s15, %s1993_s17  ;;  %p1999_p7 = scmp.lt.s32.totalorder %s1993_s17, %s1993_s17 }
  0x2f   :  { %p2000_p8 = por %p1999_p7, %p1998_p6 }
  0x31   :  { %p2001_p9 = pnand %p2000_p8, %p1994_p5 }
  0x33   :  { %2004 = shalt.err (!%p2001_p9)
}
  0x34   :  { %30 = dma.hbm_to_vmem [thread:$0]  %s2304_s0, 192, %s28_s15, [#allocation3]  }
  0x35   :  { %s2108_s19 = smov [#allocation7]   ;;  %s2109_s21 = smov [#allocation10]  }
  0x36   :  { %s50_s20 = sshll.u32 %s2108_s19, 4  ;;  %s78_s22 = sshll.u32 %s2109_s21, 4  ;;  %s51_s20 = int_to_ptr.vmem [resolvable:$true] %s50_s20  ;;  %s79_s22 = int_to_ptr.vmem [resolvable:$true] %s78_s22 }
  0x37   :  { %s2005_s18 = scalar_lea.hbm %s2307_s3, 4096 }
  0x38   :  { %p2006_p10 = scmp.ne.s32.totalorder %s2307_s3, %s2005_s18  ;;  %p2009_p11 = scmp.lt.u32.totalorder %s2005_s18, %s2307_s3 }
  0x3a   :  { %p2011_p12 = pnand %p2009_p11, %p2006_p10 }
  0x3c   :  { %2014 = shalt.err (!%p2011_p12)
}
  0x3d   :  { %s2015_s0 = scalar_lea.vmem %s51_s20, 4096  ;;  %p2020_p0 = scmp.lt.s32.totalorder %s51_s20, %s51_s20 }
  0x3e   :  { %p2016_p13 = scmp.ne.s32.totalorder %s51_s20, %s2015_s0  ;;  %p2021_p1 = scmp.lt.s32.totalorder %s2015_s0, %s2015_s0 }
  0x40   :  { %p2022_p2 = por %p2021_p1, %p2020_p0 }
  0x42   :  { %p2023_p3 = pnand %p2022_p2, %p2016_p13 }
  0x44   :  { %2026 = shalt.err (!%p2023_p3)
}
  0x45   :  { %56 = dma.hbm_to_vmem [thread:$0]  %s2307_s3, 4096, %s51_s20, [#allocation6], %s2104_s27, %s2104_s27, %s2105_s28  }
  0x46   :  { %s2027_s16 = scalar_lea.hbm %s2311_s7, 4096 }
  0x47   :  { %p2028_p4 = scmp.ne.s32.totalorder %s2311_s7, %s2027_s16  ;;  %p2031_p5 = scmp.lt.u32.totalorder %s2027_s16, %s2311_s7 }
  0x49   :  { %p2033_p6 = pnand %p2031_p5, %p2028_p4 }
  0x4b   :  { %2036 = shalt.err (!%p2033_p6)
}
  0x4c   :  { %s2037_s21 = scalar_lea.vmem %s79_s22, 4096  ;;  %p2042_p8 = scmp.lt.s32.totalorder %s79_s22, %s79_s22 }
  0x4d   :  { %p2038_p7 = scmp.ne.s32.totalorder %s79_s22, %s2037_s21  ;;  %p2043_p9 = scmp.lt.s32.totalorder %s2037_s21, %s2037_s21 }
  0x4f   :  { %p2044_p10 = por %p2043_p9, %p2042_p8 }
  0x51   :  { %p2045_p11 = pnand %p2044_p10, %p2038_p7 }
  0x53   :  { %2048 = shalt.err (!%p2045_p11)
}
  0x54   :  { %84 = dma.hbm_to_vmem [thread:$0]  %s2311_s7, 4096, %s79_s22, [#allocation9], %s2104_s27, %s2104_s27, %s2105_s28  }
  0x55   :  { %s2110_s23 = smov [#allocation11]   ;;  %s2049_s25 = scalar_lea.hbm %s2313_s9, 2048 }
  0x56   :  { %s92_s1 = sshll.u32 %s2110_s23, 4  ;;  %p2050_p12 = scmp.ne.s32.totalorder %s2313_s9, %s2049_s25  ;;  %s93_s1 = int_to_ptr.vmem [resolvable:$true] %s92_s1 }
  0x57   :  { %p2053_p13 = scmp.lt.u32.totalorder %s2049_s25, %s2313_s9 }
  0x59   :  { %p2055_p0 = pnand %p2053_p13, %p2050_p12 }
  0x5b   :  { %2058 = shalt.err (!%p2055_p0)
}
  0x5c   :  { %s2059_s30 = scalar_lea.vmem %s93_s1, 2048  ;;  %p2064_p2 = scmp.lt.s32.totalorder %s93_s1, %s93_s1 }
  0x5d   :  { %p2060_p1 = scmp.ne.s32.totalorder %s93_s1, %s2059_s30  ;;  %p2065_p3 = scmp.lt.s32.totalorder %s2059_s30, %s2059_s30 }
  0x5f   :  { %p2066_p4 = por %p2065_p3, %p2064_p2 }
  0x61   :  { %p2067_p5 = pnand %p2066_p4, %p2060_p1 }
  0x63   :  { %2070 = shalt.err (!%p2067_p5)
}
  0x64   :  { %s2111_s7 = smov 64   ;;  %s2112_s27 = smov 4  }
  0x65   :  { %98 = dma.hbm_to_vmem [thread:$0]  %s2313_s9, 2048, %s93_s1, [#allocation12], %s2111_s7, %s2111_s7, %s2112_s27  }
  0x66   :  { %2093 = dma.done.wait [#allocation3], 192  }
  0x67   :  { %2094 = vsyncadd [#allocation3], 4294967104 }
  0x68   :  { %2095 = dma.done.wait [#allocation6], 10240  }
  0x69   :  { %2096 = vsyncadd [#allocation6], 4294957056 }
  0x6a   :  { %2097 = dma.done.wait [#allocation9], 8192  }
  0x6b   :  { %2098 = vsyncadd [#allocation9], 4294959104 }
  0x6c   :  { %2099 = dma.done.wait [#allocation12], 2048  }
  0x6d   :  { %2100 = vsyncadd [#allocation12], 4294965248  ;;  %v1688_v0 = vld [vmem:[#allocation5 + $0x4] ss:$8 sps:$4 sm:$0xff]   ;;  %v1690_v1 = vld [vmem:[#allocation5] ss:$8 sps:$4 sm:$0xff]  }
  0x6e   :  { %433 = vmatprep.subr.bf16.mxu0 %v1688_v0  ;;  %v1691_v2 = vld [vmem:[#allocation5 + $0x14] ss:$8 sps:$4 sm:$0xff]   ;;  %v1693_v3 = vld [vmem:[#allocation5 + $0x10] ss:$8 sps:$4 sm:$0xff]   ;;  %v1694_v4 = vld [vmem:[#allocation5 + $0x24] ss:$8 sps:$4 sm:$0xff]  }
  0x6f   :  { %434 = vmatpush1.bf16.msra.mxu0 %v1690_v1  ;;  %v1696_v5 = vld [vmem:[#allocation5 + $0x20] ss:$8 sps:$4 sm:$0xff]   ;;  %v1697_v6 = vld [vmem:[#allocation5 + $0x34] ss:$8 sps:$4 sm:$0xff]   ;;  %v1699_v7 = vld [vmem:[#allocation5 + $0x30] ss:$8 sps:$4 sm:$0xff]  }
  0x70   :  { %435 = vmatprep.subr.bf16.mxu0 %v1691_v2  ;;  %v1700_v8 = vld [vmem:[#allocation5 + $0x44] ss:$8 sps:$4 sm:$0xff]   ;;  %v1702_v9 = vld [vmem:[#allocation5 + $0x40] ss:$8 sps:$4 sm:$0xff]   ;;  %v1703_v10 = vld [vmem:[#allocation5 + $0x54] ss:$8 sps:$4 sm:$0xff]  }
  0x71   :  { %v1705_v11 = vld [vmem:[#allocation5 + $0x50] ss:$8 sps:$4 sm:$0xff]   ;;  %v1706_v12 = vld [vmem:[#allocation5 + $0x64] ss:$8 sps:$4 sm:$0xff]   ;;  %v1708_v15 = vld [vmem:[#allocation5 + $0x60] ss:$8 sps:$4 sm:$0xff]  }
  0x72   :  { %v2259_v13 = vld [vmem:[#allocation2] sm:$0xff]  ;;  %v1712_v18 = vld [vmem:[#allocation5 + $0x84] ss:$8 sps:$4 sm:$0xff]   ;;  %v1714_v19 = vld [vmem:[#allocation5 + $0x80] ss:$8 sps:$4 sm:$0xff]   ;;  %v2113_v60 = vmov 0  }
  0x73   :  { %436 = vmatpush1.bf16.msra.mxu0 %v1693_v3  ;;  %v1485_v14 = vcombine.high %v2259_v13, %v2259_v13  ;;  %v1709_v16 = vld [vmem:[#allocation5 + $0x74] ss:$8 sps:$4 sm:$0xff]   ;;  %v1711_v17 = vld [vmem:[#allocation5 + $0x70] ss:$8 sps:$4 sm:$0xff]   ;;  %v1763_v21 = vld [vmem:[#allocation7 + $0x4] ss:$8 sps:$4 sm:$0xff]   ;;  %v1484_v53 = vcombine.low %v2259_v13, %v2259_v13 }
  0x74   :  { %437 = vmatprep.subr.bf16.mxu0 %v1694_v4  ;;  %v1715_v20 = vld [vmem:[#allocation5 + $0x94] ss:$8 sps:$4 sm:$0xff]   ;;  %v1765_v22 = vld [vmem:[#allocation7] ss:$8 sps:$4 sm:$0xff]   ;;  %v1717_v23 = vld [vmem:[#allocation5 + $0x90] ss:$8 sps:$4 sm:$0xff]   ;;  %729 = vmatprep.subr.bf16.mxu1 %v1763_v21 }
  0x75   :  { %465 = vmatprep.mubr.bf16.mxu0 %v1485_v14  ;;  %v1766_v24 = vld [vmem:[#allocation7 + $0x14] ss:$8 sps:$4 sm:$0xff]   ;;  %v1718_v25 = vld [vmem:[#allocation5 + $0xa4] ss:$8 sps:$4 sm:$0xff]   ;;  %730 = vmatpush1.bf16.msra.mxu1 %v1765_v22  ;;  %v1768_v26 = vld [vmem:[#allocation7 + $0x10] ss:$8 sps:$4 sm:$0xff]   ;;  %v172_v22 = vlaneseq }
  0x76   :  { %731 = vmatprep.subr.bf16.mxu1 %v1766_v24  ;;  %v1769_v27 = vld [vmem:[#allocation7 + $0x24] ss:$8 sps:$4 sm:$0xff]   ;;  %v1720_v28 = vld [vmem:[#allocation5 + $0xa0] ss:$8 sps:$4 sm:$0xff]   ;;  %v1721_v29 = vld [vmem:[#allocation5 + $0xb4] ss:$8 sps:$4 sm:$0xff]  }
  0x77   :  { %438 = vmatpush1.bf16.msra.mxu0 %v1696_v5  ;;  %v1771_v30 = vld [vmem:[#allocation7 + $0x20] ss:$8 sps:$4 sm:$0xff]   ;;  %v1772_v31 = vld [vmem:[#allocation7 + $0x34] ss:$8 sps:$4 sm:$0xff]   ;;  %v1723_v32 = vld [vmem:[#allocation5 + $0xb0] ss:$8 sps:$4 sm:$0xff]  }
  0x78   :  { %439 = vmatprep.subr.bf16.mxu0 %v1697_v6  ;;  %v1724_v33 = vld [vmem:[#allocation5 + $0xc4] ss:$8 sps:$4 sm:$0xff]   ;;  %v1774_v34 = vld [vmem:[#allocation7 + $0x30] ss:$8 sps:$4 sm:$0xff]   ;;  %v1726_v35 = vld [vmem:[#allocation5 + $0xc0] ss:$8 sps:$4 sm:$0xff]  }
  0x79   :  { %732 = vmatpush1.bf16.msra.mxu1 %v1768_v26  ;;  %v1775_v36 = vld [vmem:[#allocation7 + $0x44] ss:$8 sps:$4 sm:$0xff]   ;;  %v1727_v37 = vld [vmem:[#allocation5 + $0xd4] ss:$8 sps:$4 sm:$0xff]   ;;  %v1777_v38 = vld [vmem:[#allocation7 + $0x40] ss:$8 sps:$4 sm:$0xff]  }
  0x7a   :  { %733 = vmatprep.subr.bf16.mxu1 %v1769_v27  ;;  %v1778_v39 = vld [vmem:[#allocation7 + $0x54] ss:$8 sps:$4 sm:$0xff]   ;;  %v1729_v40 = vld [vmem:[#allocation5 + $0xd0] ss:$8 sps:$4 sm:$0xff]   ;;  %v1730_v41 = vld [vmem:[#allocation5 + $0xe4] ss:$8 sps:$4 sm:$0xff]  }
  0x7b   :  { %440 = vmatpush1.bf16.msra.mxu0 %v1699_v7  ;;  %v1780_v42 = vld [vmem:[#allocation7 + $0x50] ss:$8 sps:$4 sm:$0xff]   ;;  %v1781_v43 = vld [vmem:[#allocation7 + $0x64] ss:$8 sps:$4 sm:$0xff]   ;;  %v1732_v44 = vld [vmem:[#allocation5 + $0xe0] ss:$8 sps:$4 sm:$0xff]  }
  0x7c   :  { %441 = vmatprep.subr.bf16.mxu0 %v1700_v8  ;;  %v1733_v45 = vld [vmem:[#allocation5 + $0xf4] ss:$8 sps:$4 sm:$0xff]   ;;  %v1783_v46 = vld [vmem:[#allocation7 + $0x60] ss:$8 sps:$4 sm:$0xff]   ;;  %v1735_v48 = vld [vmem:[#allocation5 + $0xf0] ss:$8 sps:$4 sm:$0xff]  }
  0x7d   :  { %734 = vmatpush1.bf16.msra.mxu1 %v1771_v30  ;;  %v1784_v47 = vld [vmem:[#allocation7 + $0x74] ss:$8 sps:$4 sm:$0xff]   ;;  %v1740_v49 = vld [vmem:[#allocation5 + $0x104] ss:$8 sps:$4 sm:$0xff]   ;;  %v1786_v50 = vld [vmem:[#allocation7 + $0x70] ss:$8 sps:$4 sm:$0xff]  }
  0x7e   :  { %735 = vmatprep.subr.bf16.mxu1 %v1772_v31  ;;  %v1787_v51 = vld [vmem:[#allocation7 + $0x84] ss:$8 sps:$4 sm:$0xff]   ;;  %v1738_v52 = vld [vmem:[#allocation5 + $0x100] ss:$8 sps:$4 sm:$0xff]   ;;  %v1743_v54 = vld [vmem:[#allocation5 + $0x114] ss:$8 sps:$4 sm:$0xff]  }
  0x7f   :  { %442 = vmatpush1.bf16.msra.mxu0 %v1702_v9  ;;  %v1789_v55 = vld [vmem:[#allocation7 + $0x80] ss:$8 sps:$4 sm:$0xff]   ;;  %v1790_v56 = vld [vmem:[#allocation7 + $0x94] ss:$8 sps:$4 sm:$0xff]   ;;  %v1741_v57 = vld [vmem:[#allocation5 + $0x110] ss:$8 sps:$4 sm:$0xff]  }
  0x80   :  { %443 = vmatprep.subr.bf16.mxu0 %v1703_v10  ;;  %v1746_v58 = vld [vmem:[#allocation5 + $0x124] ss:$8 sps:$4 sm:$0xff]   ;;  %v1792_v59 = vld [vmem:[#allocation7 + $0x90] ss:$8 sps:$4 sm:$0xff]   ;;  %v1744_v61 = vld [vmem:[#allocation5 + $0x120] ss:$8 sps:$4 sm:$0xff]  }
  0x81   :  { %736 = vmatpush1.bf16.msra.mxu1 %v1774_v34  ;;  %v1749_v62 = vld [vmem:[#allocation5 + $0x134] ss:$8 sps:$4 sm:$0xff]   ;;  %v1747_v63 = vld [vmem:[#allocation5 + $0x130] ss:$8 sps:$4 sm:$0xff]   ;;  %v1752_v0 = vld [vmem:[#allocation5 + $0x144] ss:$8 sps:$4 sm:$0xff]  }
  0x82   :  { %737 = vmatprep.subr.bf16.mxu1 %v1775_v36  ;;  %v1750_v1 = vld [vmem:[#allocation5 + $0x140] ss:$8 sps:$4 sm:$0xff]   ;;  %v1755_v2 = vld [vmem:[#allocation5 + $0x154] ss:$8 sps:$4 sm:$0xff]   ;;  %v1753_v3 = vld [vmem:[#allocation5 + $0x150] ss:$8 sps:$4 sm:$0xff]  }
  0x83   :  { %444 = vmatpush1.bf16.msra.mxu0 %v1705_v11  ;;  %v1758_v4 = vld [vmem:[#allocation5 + $0x164] ss:$8 sps:$4 sm:$0xff]   ;;  %v1756_v5 = vld [vmem:[#allocation5 + $0x160] ss:$8 sps:$4 sm:$0xff]   ;;  %v1761_v6 = vld [vmem:[#allocation5 + $0x174] ss:$8 sps:$4 sm:$0xff]  }
  0x84   :  { %445 = vmatprep.subr.bf16.mxu0 %v1706_v12  ;;  %v1759_v7 = vld [vmem:[#allocation5 + $0x170] ss:$8 sps:$4 sm:$0xff]   ;;  %v1762_v8 = vld [vmem:[#allocation2 + $0x8] ss:$0 sps:$4 sm:$0xff]   ;;  %v1793_v9 = vld [vmem:[#allocation7 + $0xa4] ss:$8 sps:$4 sm:$0xff]  }
  0x85   :  { %738 = vmatpush1.bf16.msra.mxu1 %v1777_v38  ;;  %v1795_v10 = vld [vmem:[#allocation7 + $0xa0] ss:$8 sps:$4 sm:$0xff]   ;;  %v1796_v11 = vld [vmem:[#allocation7 + $0xb4] ss:$8 sps:$4 sm:$0xff]   ;;  %v1798_v12 = vld [vmem:[#allocation7 + $0xb0] ss:$8 sps:$4 sm:$0xff]  }
  0x86   :  { %739 = vmatprep.subr.bf16.mxu1 %v1778_v39  ;;  %v1799_v13 = vld [vmem:[#allocation7 + $0xc4] ss:$8 sps:$4 sm:$0xff]   ;;  %v1801_v14 = vld [vmem:[#allocation7 + $0xc0] ss:$8 sps:$4 sm:$0xff]   ;;  %s2114_s13 = smov [#allocation13]  }
  0x87   :  { %446 = vmatpush1.bf16.msra.mxu0 %v1708_v15  ;;  %v1802_v15 = vld [vmem:[#allocation7 + $0xd4] ss:$8 sps:$4 sm:$0xff]   ;;  %v1813_v21 = vld [vmem:[#allocation8 + $0x4] ss:$8 sps:$4 sm:$0xff]   ;;  %s1472_s19 = sshll.u32 %s2114_s13, 4  ;;  %s1473_s19 = int_to_ptr.vmem [resolvable:$true] %s1472_s19 }
  0x88   :  { %447 = vmatprep.subr.bf16.mxu0 %v1709_v16  ;;  %v1804_v16 = vld [vmem:[#allocation7 + $0xd0] ss:$8 sps:$4 sm:$0xff]   ;;  %s2071_s21 = scalar_lea.vmem %s1473_s19, 128  ;;  %p2076_p7 = scmp.lt.s32.totalorder %s1473_s19, %s1473_s19 }
  0x89   :  { %740 = vmatpush1.bf16.msra.mxu1 %v1780_v42  ;;  %p2072_p6 = scmp.ne.s32.totalorder %s1473_s19, %s2071_s21  ;;  %p2077_p8 = scmp.lt.s32.totalorder %s2071_s21, %s2071_s21 }
  0x8a   :  { %741 = vmatprep.subr.bf16.mxu1 %v1781_v43 }
  0x8b   :  { %448 = vmatpush1.bf16.msra.mxu0 %v1711_v17  ;;  %v1805_v17 = vld [vmem:[#allocation7 + $0xe4] ss:$8 sps:$4 sm:$0xff]   ;;  %p2078_p9 = por %p2077_p8, %p2076_p7 }
  0x8c   :  { %449 = vmatprep.subr.bf16.mxu0 %v1712_v18  ;;  %v1807_v18 = vld [vmem:[#allocation7 + $0xe0] ss:$8 sps:$4 sm:$0xff]  }
  0x8d   :  { %742 = vmatpush1.bf16.msra.mxu1 %v1783_v46  ;;  %v1816_v46 = vld [vmem:[#allocation8 + $0x14] ss:$8 sps:$4 sm:$0xff]   ;;  %p2079_p10 = pnand %p2078_p9, %p2072_p6 }
  0x8e   :  { %743 = vmatprep.subr.bf16.mxu1 %v1784_v47  ;;  %v1814_v47 = vld [vmem:[#allocation8 + $0x10] ss:$8 sps:$4 sm:$0xff]  }
  0x8f   :  { %450 = vmatpush1.bf16.msra.mxu0 %v1714_v19  ;;  %v1808_v19 = vld [vmem:[#allocation7 + $0xf4] ss:$8 sps:$4 sm:$0xff]  }
  0x90   :  { %451 = vmatprep.subr.bf16.mxu0 %v1715_v20  ;;  %v1810_v20 = vld [vmem:[#allocation7 + $0xf0] ss:$8 sps:$4 sm:$0xff]  }
  0x91   :  { %744 = vmatpush1.bf16.msra.mxu1 %v1786_v50  ;;  %v1822_v50 = vld [vmem:[#allocation8 + $0x34] ss:$8 sps:$4 sm:$0xff]  }
  0x92   :  { %745 = vmatprep.subr.bf16.mxu1 %v1787_v51  ;;  %v1820_v51 = vld [vmem:[#allocation8 + $0x30] ss:$8 sps:$4 sm:$0xff]  }
  0x93   :  { %452 = vmatpush1.bf16.msra.mxu0 %v1717_v23  ;;  %v173_v23 = vshrl.u32 %v172_v22, 7  ;;  %v1876_v22 = vld [vmem:[#allocation10 + $0x54] ss:$8 sps:$4 sm:$0xff]  }
  0x94   :  { %453 = vmatprep.subr.bf16.mxu0 %v1718_v25  ;;  %v170_v25 = vld [vmem:[%s2306_s2] sm:$0x3] }
  0x95   :  { %746 = vmatpush1.bf16.msra.mxu1 %v1789_v55  ;;  %v2265_v24 = vsub.s32 0, %v173_v23  ;;  %v2270_v26 = vsub.s32 1, %v173_v23  ;;  %v1826_v55 = vld [vmem:[#allocation8 + $0x50] ss:$8 sps:$4 sm:$0xff]  }
  0x96   :  { %747 = vmatprep.subr.bf16.mxu1 %v1790_v56  ;;  %v1831_v56 = vld [vmem:[#allocation8 + $0x64] ss:$8 sps:$4 sm:$0xff]   ;;  %v1874_v23 = vld [vmem:[#allocation10 + $0x50] ss:$8 sps:$4 sm:$0xff]  }
  0x97   :  { %454 = vmatpush1.bf16.msra.mxu0 %v1720_v28  ;;  %v175_v27 = vrot.slane %v170_v25, %v2265_v24  ;;  %v179_v28 = vrot.slane %v170_v25, %v2270_v26  ;;  %v1879_v25 = vld [vmem:[#allocation10 + $0x64] ss:$8 sps:$4 sm:$0xff]  }
  0x98   :  { %455 = vmatprep.subr.bf16.mxu0 %v1721_v29 }
  0x99   :  { %748 = vmatpush1.bf16.msra.mxu1 %v1792_v59  ;;  %v1832_v59 = vld [vmem:[#allocation8 + $0x70] ss:$8 sps:$4 sm:$0xff]  }
  0x9a   :  { %749 = vmatprep.subr.bf16.mxu1 %v1793_v9  ;;  %v1853_v9 = vld [vmem:[#allocation8 + $0xe0] ss:$8 sps:$4 sm:$0xff]  }
  0x9b   :  { %456 = vmatpush1.bf16.msra.mxu0 %v1723_v32 }
  0x9c   :  { %457 = vmatprep.subr.bf16.mxu0 %v1724_v33 }
  0x9d   :  { %750 = vmatpush1.bf16.msra.mxu1 %v1795_v10  ;;  %v1858_v10 = vld [vmem:[#allocation8 + $0xf4] ss:$8 sps:$4 sm:$0xff]  }
  0x9e   :  { %751 = vmatprep.subr.bf16.mxu1 %v1796_v11  ;;  %v1856_v11 = vld [vmem:[#allocation8 + $0xf0] ss:$8 sps:$4 sm:$0xff]  }
  0x9f   :  { %458 = vmatpush1.bf16.msra.mxu0 %v1726_v35 }
  0xa0   :  { %459 = vmatprep.subr.bf16.mxu0 %v1727_v37 }
  0xa1   :  { %752 = vmatpush1.bf16.msra.mxu1 %v1798_v12  ;;  %v1859_v12 = vld [vmem:[#allocation10] ss:$8 sps:$4 sm:$0xff]  }
  0xa2   :  { %753 = vmatprep.subr.bf16.mxu1 %v1799_v13  ;;  %v1861_v13 = vld [vmem:[#allocation10 + $0x4] ss:$8 sps:$4 sm:$0xff]  }
  0xa3   :  { %460 = vmatpush1.bf16.msra.mxu0 %v1729_v40 }
  0xa4   :  { %461 = vmatprep.subr.bf16.mxu0 %v1730_v41 }
  0xa5   :  { %754 = vmatpush1.bf16.msra.mxu1 %v1801_v14  ;;  %v1864_v14 = vld [vmem:[#allocation10 + $0x14] ss:$8 sps:$4 sm:$0xff]  }
  0xa6   :  { %755 = vmatprep.subr.bf16.mxu1 %v1802_v15  ;;  %v1862_v15 = vld [vmem:[#allocation10 + $0x10] ss:$8 sps:$4 sm:$0xff]  }
  0xa7   :  { %462 = vmatpush1.bf16.msra.mxu0 %v1732_v44  ;;  %v1811_v44 = vld [vmem:[#allocation8] ss:$8 sps:$4 sm:$0xff]  }
  0xa8   :  { %463 = vmatprep.subr.bf16.mxu0 %v1733_v45 }
  0xa9   :  { %756 = vmatpush1.bf16.msra.mxu1 %v1804_v16  ;;  %v1867_v16 = vld [vmem:[#allocation10 + $0x24] ss:$8 sps:$4 sm:$0xff]  }
  0xaa   :  { %757 = vmatprep.subr.bf16.mxu1 %v1805_v17  ;;  %v1865_v17 = vld [vmem:[#allocation10 + $0x20] ss:$8 sps:$4 sm:$0xff]  }
  0xab   :  { %464 = vmatpush1.bf16.msra.mxu0 %v1735_v48  ;;  %v1819_v48 = vld [vmem:[#allocation8 + $0x24] ss:$8 sps:$4 sm:$0xff]  }
  0xac   :  { %474 = vmatprep.subr.bf16.mxu0 %v1740_v49  ;;  %v1817_v49 = vld [vmem:[#allocation8 + $0x20] ss:$8 sps:$4 sm:$0xff]  }
  0xad   :  { %758 = vmatpush1.bf16.msra.mxu1 %v1807_v18  ;;  %v1870_v18 = vld [vmem:[#allocation10 + $0x34] ss:$8 sps:$4 sm:$0xff]  }
  0xae   :  { %466 = vmatmul.mubr.bf16.vlgmr.msra.gmra.mrb[0].mxu0 %v1484_v53  ;;  %759 = vmatprep.subr.bf16.mxu1 %v1808_v19  ;;  %v1823_v53 = vld [vmem:[#allocation8 + $0x40] ss:$8 sps:$4 sm:$0xff]   ;;  %v1868_v19 = vld [vmem:[#allocation10 + $0x30] ss:$8 sps:$4 sm:$0xff]  }
  0xaf   :  { %475 = vmatpush1.bf16.msra.mxu0 %v1738_v52  ;;  %506 = vmatprep.mubr.bf16.mxu0 %v2113_v60  ;;  %v1825_v52 = vld [vmem:[#allocation8 + $0x44] ss:$8 sps:$4 sm:$0xff]  }
  0xb0   :  { %476 = vmatprep.subr.bf16.mxu0 %v1743_v54  ;;  %v1828_v54 = vld [vmem:[#allocation8 + $0x54] ss:$8 sps:$4 sm:$0xff]   ;;  %v1837_v60 = vld [vmem:[#allocation8 + $0x84] ss:$8 sps:$4 sm:$0xff]  }
  0xb1   :  { %760 = vmatpush1.bf16.msra.mxu1 %v1810_v20  ;;  %v1873_v20 = vld [vmem:[#allocation10 + $0x44] ss:$8 sps:$4 sm:$0xff]  }
  0xb2   :  { %984 = vmatprep.subr.bf16.mxu1 %v1813_v21  ;;  %v1871_v21 = vld [vmem:[#allocation10 + $0x40] ss:$8 sps:$4 sm:$0xff]  }
  0xb3   :  { %477 = vmatpush1.bf16.msra.mxu0 %v1741_v57  ;;  %v1829_v57 = vld [vmem:[#allocation8 + $0x60] ss:$8 sps:$4 sm:$0xff]  }
  0xb4   :  { %478 = vmatprep.subr.bf16.mxu0 %v1746_v58  ;;  %v1834_v58 = vld [vmem:[#allocation8 + $0x74] ss:$8 sps:$4 sm:$0xff]  }
  0xb7   :  { %479 = vmatpush1.bf16.msra.mxu0 %v1744_v61  ;;  %v1835_v61 = vld [vmem:[#allocation8 + $0x80] ss:$8 sps:$4 sm:$0xff]  }
  0xb8   :  { %480 = vmatprep.subr.bf16.mxu0 %v1749_v62  ;;  %v1840_v62 = vld [vmem:[#allocation8 + $0x94] ss:$8 sps:$4 sm:$0xff]  }
  0xbb   :  { %481 = vmatpush1.bf16.msra.mxu0 %v1747_v63  ;;  %v1838_v63 = vld [vmem:[#allocation8 + $0x90] ss:$8 sps:$4 sm:$0xff]  }
  0xbc   :  { %482 = vmatprep.subr.bf16.mxu0 %v1752_v0  ;;  %v1843_v0 = vld [vmem:[#allocation8 + $0xa4] ss:$8 sps:$4 sm:$0xff]  }
  0xbf   :  { %483 = vmatpush1.bf16.msra.mxu0 %v1750_v1  ;;  %v1841_v1 = vld [vmem:[#allocation8 + $0xa0] ss:$8 sps:$4 sm:$0xff]  }
  0xc0   :  { %484 = vmatprep.subr.bf16.mxu0 %v1755_v2  ;;  %v1846_v2 = vld [vmem:[#allocation8 + $0xb4] ss:$8 sps:$4 sm:$0xff]  }
  0xc3   :  { %485 = vmatpush1.bf16.msra.mxu0 %v1753_v3  ;;  %v1844_v3 = vld [vmem:[#allocation8 + $0xb0] ss:$8 sps:$4 sm:$0xff]  }
  0xc4   :  { %486 = vmatprep.subr.bf16.mxu0 %v1758_v4  ;;  %v1849_v4 = vld [vmem:[#allocation8 + $0xc4] ss:$8 sps:$4 sm:$0xff]  }
  0xc7   :  { %487 = vmatpush1.bf16.msra.mxu0 %v1756_v5  ;;  %v1847_v5 = vld [vmem:[#allocation8 + $0xc0] ss:$8 sps:$4 sm:$0xff]  }
  0xc8   :  { %488 = vmatprep.subr.bf16.mxu0 %v1761_v6  ;;  %v1852_v6 = vld [vmem:[#allocation8 + $0xd4] ss:$8 sps:$4 sm:$0xff]  }
  0xcb   :  { %489 = vmatpush1.bf16.msra.mxu0 %v1759_v7  ;;  %v1850_v7 = vld [vmem:[#allocation8 + $0xd0] ss:$8 sps:$4 sm:$0xff]  }
  0xcc   :  { %1239 = vmatprep.subr.bf16.mxu0 %v1861_v13 }
  0xce   :  { %507 = vmatmul.mubr.bf16.vlgmr.msra.gmra.mrb[0].mxu0 %v1762_v8  ;;  %v1855_v8 = vld [vmem:[#allocation8 + $0xe4] ss:$8 sps:$4 sm:$0xff]  }
  0xcf   :  { %1240 = vmatpush1.bf16.msra.mxu0 %v1859_v12 }
  0xd0   :  { %1241 = vmatprep.subr.bf16.mxu0 %v1864_v14 }
  0xd3   :  { %1242 = vmatpush1.bf16.msra.mxu0 %v1862_v15 }
  0xd4   :  { %1243 = vmatprep.subr.bf16.mxu0 %v1867_v16 }
  0xd7   :  { %1244 = vmatpush1.bf16.msra.mxu0 %v1865_v17 }
  0xd8   :  { %1245 = vmatprep.subr.bf16.mxu0 %v1870_v18 }
  0xdb   :  { %1246 = vmatpush1.bf16.msra.mxu0 %v1868_v19 }
  0xdc   :  { %1247 = vmatprep.subr.bf16.mxu0 %v1873_v20 }
  0xdf   :  { %1248 = vmatpush1.bf16.msra.mxu0 %v1871_v21 }
  0xe0   :  { %1249 = vmatprep.subr.bf16.mxu0 %v1876_v22 }
  0xe3   :  { %1250 = vmatpush1.bf16.msra.mxu0 %v1874_v23 }
  0xe4   :  { %1251 = vmatprep.subr.bf16.mxu0 %v1879_v25  ;;  %v1911_v25 = vld [vmem:[#allocation11 + $0x50] sm:$0xff]  }
 0x1a1   :  { %v508_v29 = vpop.f32.mrb[0].mxu0 }
 0x1a2   :  { %v1670_v30 = vadd.f32 %v508_v29, %v175_v27  ;;  %v510_v31 = vpop.f32.mrb[1].mxu0  ;;  %v1877_v27 = vld [vmem:[#allocation10 + $0x60] ss:$8 sps:$4 sm:$0xff]   ;;  %v1880_v29 = vld [vmem:[#allocation10 + $0x70] ss:$8 sps:$4 sm:$0xff]  }
 0x1a3   :  { %v1671_v32 = vadd.f32 %v510_v31, %v179_v28  ;;  %v512_v33 = vpop.f32.mrb[2].mxu0  ;;  %v1882_v28 = vld [vmem:[#allocation10 + $0x74] ss:$8 sps:$4 sm:$0xff]   ;;  %1252 = vmatpush1.bf16.msra.mxu0 %v1877_v27  ;;  %v1883_v31 = vld [vmem:[#allocation10 + $0x80] ss:$8 sps:$4 sm:$0xff]  }
 0x1a4   :  { %v515_v34 = vmul.f32 0.5, %v1670_v30  ;;  %v513_v35 = vpop.f32.mrb[3].mxu0  ;;  %1253 = vmatprep.subr.bf16.mxu0 %v1882_v28  ;;  %v1885_v30 = vld [vmem:[#allocation10 + $0x84] ss:$8 sps:$4 sm:$0xff]   ;;  %v1886_v33 = vld [vmem:[#allocation10 + $0x90] ss:$8 sps:$4 sm:$0xff]  }
 0x1a5   :  { %v516_v36 = vmul.f32 0.5, %v1671_v32  ;;  %v1888_v32 = vld [vmem:[#allocation10 + $0x94] ss:$8 sps:$4 sm:$0xff]  }
 0x1a6   :  { %1923 = vtanh.f32 %v515_v34  ;;  %v557_v34 = vld [vmem:[%s2308_s4] sm:$0x3]  ;;  %v1913_v28 = vld [vmem:[#allocation11 + $0x58] sm:$0xff]  }
 0x1a7   :  { %1925 = vtanh.f32 %v516_v36  ;;  %1254 = vmatpush1.bf16.msra.mxu0 %v1880_v29  ;;  %v562_v35 = vrot.slane %v557_v34, %v2265_v24  ;;  %v566_v36 = vrot.slane %v557_v34, %v2270_v26  ;;  %v1912_v27 = vld [vmem:[#allocation11 + $0x10] sm:$0xff]   ;;  %v1914_v29 = vld [vmem:[#allocation11 + $0x18] sm:$0xff]  }
 0x1a8   :  { %1255 = vmatprep.subr.bf16.mxu0 %v1885_v30  ;;  %v1915_v30 = vld [vmem:[#allocation11 + $0x60] sm:$0xff]   ;;  %v1919_v34 = vld [vmem:[#allocation11 + $0x70] sm:$0xff]  }
 0x1ab   :  { %1256 = vmatpush1.bf16.msra.mxu0 %v1883_v31  ;;  %v1916_v31 = vld [vmem:[#allocation11 + $0x20] sm:$0xff]  }
 0x1ac   :  { %1257 = vmatprep.subr.bf16.mxu0 %v1888_v32  ;;  %v1917_v32 = vld [vmem:[#allocation11 + $0x68] sm:$0xff]  }
 0x1af   :  { %1258 = vmatpush1.bf16.msra.mxu0 %v1886_v33  ;;  %v1918_v33 = vld [vmem:[#allocation11 + $0x28] sm:$0xff]  }
 0x1b0   :  { %v1924_v37 = vpop.eup %1923 }
 0x1b1   :  { %v1926_v38 = vpop.eup %1925  ;;  %v519_v39 = vadd.f32 1.0, %v1924_v37 }
 0x1b2   :  { %v520_v40 = vadd.f32 1.0, %v1926_v38 }
 0x1b3   :  { %v521_v41 = vmul.f32 0.5, %v519_v39 }
 0x1b4   :  { %v522_v42 = vmul.f32 0.5, %v520_v40 }
 0x1b5   :  { %v523_v45 = vpack.c.bf16 %v521_v41, %v521_v41 }
 0x1b6   :  { %v524_v43 = vpack.c.bf16 %v522_v42, %v522_v42 }
 0x1b8   :  { %761 = vmatprep.mubr.bf16.mxu1 %v524_v43 }
 0x1b9   :  { %762 = vmatmul.mubr.bf16.vlgmr.msra.gmra.mrb[0].mxu1 %v523_v45 }
 0x1ba   :  { %985 = vmatpush1.bf16.msra.mxu1 %v1811_v44 }
 0x1bb   :  { %986 = vmatprep.subr.bf16.mxu1 %v1816_v46 }
 0x1be   :  { %987 = vmatpush1.bf16.msra.mxu1 %v1814_v47 }
 0x1bf   :  { %988 = vmatprep.subr.bf16.mxu1 %v1819_v48 }
 0x1c2   :  { %989 = vmatpush1.bf16.msra.mxu1 %v1817_v49 }
 0x1c3   :  { %990 = vmatprep.subr.bf16.mxu1 %v1822_v50 }
 0x1c6   :  { %991 = vmatpush1.bf16.msra.mxu1 %v1820_v51 }
 0x1c7   :  { %992 = vmatprep.subr.bf16.mxu1 %v1825_v52 }
 0x1ca   :  { %993 = vmatpush1.bf16.msra.mxu1 %v1823_v53  ;;  %v1891_v53 = vld [vmem:[#allocation10 + $0xa4] ss:$8 sps:$4 sm:$0xff]  }
 0x1cb   :  { %994 = vmatprep.subr.bf16.mxu1 %v1828_v54  ;;  %v1889_v54 = vld [vmem:[#allocation10 + $0xa0] ss:$8 sps:$4 sm:$0xff]   ;;  %1259 = vmatprep.subr.bf16.mxu0 %v1891_v53 }
 0x1cc   :  { %1260 = vmatpush1.bf16.msra.mxu0 %v1889_v54 }
 0x1ce   :  { %995 = vmatpush1.bf16.msra.mxu1 %v1826_v55  ;;  %v1894_v55 = vld [vmem:[#allocation10 + $0xb4] ss:$8 sps:$4 sm:$0xff]  }
 0x1cf   :  { %996 = vmatprep.subr.bf16.mxu1 %v1831_v56  ;;  %v1892_v56 = vld [vmem:[#allocation10 + $0xb0] ss:$8 sps:$4 sm:$0xff]   ;;  %1261 = vmatprep.subr.bf16.mxu0 %v1894_v55 }
 0x1d0   :  { %1262 = vmatpush1.bf16.msra.mxu0 %v1892_v56  ;;  %v1631_v56 = vld [vmem:[%s2314_s10] ss:$0 sm:$0xff] }
 0x1d2   :  { %997 = vmatpush1.bf16.msra.mxu1 %v1829_v57  ;;  %v1897_v57 = vld [vmem:[#allocation10 + $0xc4] ss:$8 sps:$4 sm:$0xff]  }
 0x1d3   :  { %998 = vmatprep.subr.bf16.mxu1 %v1834_v58  ;;  %v1895_v58 = vld [vmem:[#allocation10 + $0xc0] ss:$8 sps:$4 sm:$0xff]   ;;  %1263 = vmatprep.subr.bf16.mxu0 %v1897_v57 }
 0x1d4   :  { %1264 = vmatpush1.bf16.msra.mxu0 %v1895_v58 }
 0x1d6   :  { %999 = vmatpush1.bf16.msra.mxu1 %v1832_v59  ;;  %v1900_v59 = vld [vmem:[#allocation10 + $0xd4] ss:$8 sps:$4 sm:$0xff]  }
 0x1d7   :  { %1000 = vmatprep.subr.bf16.mxu1 %v1837_v60  ;;  %v1898_v60 = vld [vmem:[#allocation10 + $0xd0] ss:$8 sps:$4 sm:$0xff]   ;;  %1265 = vmatprep.subr.bf16.mxu0 %v1900_v59 }
 0x1d8   :  { %1266 = vmatpush1.bf16.msra.mxu0 %v1898_v60 }
 0x1da   :  { %1001 = vmatpush1.bf16.msra.mxu1 %v1835_v61  ;;  %v1903_v61 = vld [vmem:[#allocation10 + $0xe4] ss:$8 sps:$4 sm:$0xff]  }
 0x1db   :  { %1002 = vmatprep.subr.bf16.mxu1 %v1840_v62  ;;  %v1901_v62 = vld [vmem:[#allocation10 + $0xe0] ss:$8 sps:$4 sm:$0xff]   ;;  %1267 = vmatprep.subr.bf16.mxu0 %v1903_v61 }
 0x1dc   :  { %1268 = vmatpush1.bf16.msra.mxu0 %v1901_v62 }
 0x1de   :  { %1003 = vmatpush1.bf16.msra.mxu1 %v1838_v63  ;;  %v1906_v63 = vld [vmem:[#allocation10 + $0xf4] ss:$8 sps:$4 sm:$0xff]  }
 0x1df   :  { %1004 = vmatprep.subr.bf16.mxu1 %v1843_v0  ;;  %v1904_v0 = vld [vmem:[#allocation10 + $0xf0] ss:$8 sps:$4 sm:$0xff]   ;;  %1269 = vmatprep.subr.bf16.mxu0 %v1906_v63 }
 0x1e0   :  { %1270 = vmatpush1.bf16.msra.mxu0 %v1904_v0 }
 0x1e2   :  { %1005 = vmatpush1.bf16.msra.mxu1 %v1841_v1  ;;  %v1907_v1 = vld [vmem:[#allocation11 + $0x40] sm:$0xff]  }
 0x1e3   :  { %1006 = vmatprep.subr.bf16.mxu1 %v1846_v2  ;;  %v1908_v2 = vld [vmem:[#allocation11] sm:$0xff]  }
 0x1e6   :  { %1007 = vmatpush1.bf16.msra.mxu1 %v1844_v3  ;;  %v1909_v3 = vld [vmem:[#allocation11 + $0x48] sm:$0xff]  }
 0x1e7   :  { %1008 = vmatprep.subr.bf16.mxu1 %v1849_v4  ;;  %v1910_v4 = vld [vmem:[#allocation11 + $0x8] sm:$0xff]  }
 0x1ea   :  { %1009 = vmatpush1.bf16.msra.mxu1 %v1847_v5  ;;  %v812_v5 = vld [vmem:[%s2310_s6] sm:$0x3] }
 0x1eb   :  { %1010 = vmatprep.subr.bf16.mxu1 %v1852_v6  ;;  %v817_v6 = vrot.slane %v812_v5, %v2265_v24 }
 0x1ee   :  { %1011 = vmatpush1.bf16.msra.mxu1 %v1850_v7  ;;  %v821_v7 = vrot.slane %v812_v5, %v2270_v26 }
 0x1ef   :  { %1012 = vmatprep.subr.bf16.mxu1 %v1855_v8 }
 0x1f2   :  { %1013 = vmatpush1.bf16.msra.mxu1 %v1853_v9 }
 0x1f3   :  { %1014 = vmatprep.subr.bf16.mxu1 %v1858_v10 }
 0x1f6   :  { %1015 = vmatpush1.bf16.msra.mxu1 %v1856_v11 }
 0x1f7   :  { %1648 = vmatprep.subr.bf16.mxu1 %v1907_v1 }
 0x28c   :  { %v763_v37 = vpop.f32.mrb[0].mxu1 }
 0x28d   :  { %v764_v38 = vadd.f32 %v763_v37, %v562_v35  ;;  %v765_v39 = vpop.f32.mrb[1].mxu1  ;;  %v1920_v35 = vld [vmem:[#allocation11 + $0x30] sm:$0xff]   ;;  %v1922_v37 = vld [vmem:[#allocation11 + $0x38] sm:$0xff]  }
 0x28e   :  { %v766_v40 = vadd.f32 %v765_v39, %v566_v36  ;;  %v767_v41 = vpop.f32.mrb[2].mxu1  ;;  %v1921_v36 = vld [vmem:[#allocation11 + $0x78] sm:$0xff]  }
 0x28f   :  { %v770_v42 = vmul.f32 0.5, %v764_v38  ;;  %v768_v43 = vpop.f32.mrb[3].mxu1  ;;  %v1067_v38 = vld [vmem:[%s2312_s8] sm:$0x3] }
 0x290   :  { %v771_v44 = vmul.f32 0.5, %v766_v40  ;;  %v1072_v39 = vrot.slane %v1067_v38, %v2265_v24  ;;  %v1076_v40 = vrot.slane %v1067_v38, %v2270_v26 }
 0x291   :  { %1927 = vtanh.f32 %v770_v42 }
 0x292   :  { %1929 = vtanh.f32 %v771_v44 }
 0x29b   :  { %v1928_v45 = vpop.eup %1927 }
 0x29c   :  { %v1930_v46 = vpop.eup %1929  ;;  %v774_v47 = vadd.f32 1.0, %v1928_v45 }
 0x29d   :  { %v775_v48 = vadd.f32 1.0, %v1930_v46 }
 0x29e   :  { %v776_v49 = vmul.f32 0.5, %v774_v47 }
 0x29f   :  { %v777_v50 = vmul.f32 0.5, %v775_v48 }
 0x2a0   :  { %v778_v52 = vpack.c.bf16 %v776_v49, %v776_v49 }
 0x2a1   :  { %v779_v51 = vpack.c.bf16 %v777_v50, %v777_v50 }
 0x2a3   :  { %1016 = vmatprep.mubr.bf16.mxu1 %v779_v51 }
 0x2a4   :  { %1017 = vmatmul.mubr.bf16.vlgmr.msra.gmra.mrb[4].mxu1 %v778_v52 }
 0x2a5   :  { %1649 = vmatpush3.bf16.msra.mxu1 %v1908_v2 }
 0x2a6   :  { %1650 = vmatprep.subr.bf16.mxu1 %v1909_v3 }
 0x2a9   :  { %1651 = vmatpush3.bf16.msra.mxu1 %v1910_v4 }
 0x2aa   :  { %1652 = vmatprep.subr.bf16.mxu1 %v1911_v25 }
 0x2ad   :  { %1653 = vmatpush3.bf16.msra.mxu1 %v1912_v27 }
 0x2ae   :  { %1654 = vmatprep.subr.bf16.mxu1 %v1913_v28 }
 0x2b1   :  { %1655 = vmatpush3.bf16.msra.mxu1 %v1914_v29 }
 0x2b2   :  { %1656 = vmatprep.subr.bf16.mxu1 %v1915_v30 }
 0x2b5   :  { %1657 = vmatpush3.bf16.msra.mxu1 %v1916_v31 }
 0x2b6   :  { %1658 = vmatprep.subr.bf16.mxu1 %v1917_v32 }
 0x2b9   :  { %1659 = vmatpush3.bf16.msra.mxu1 %v1918_v33 }
 0x2ba   :  { %1660 = vmatprep.subr.bf16.mxu1 %v1919_v34 }
 0x2bd   :  { %1661 = vmatpush3.bf16.msra.mxu1 %v1920_v35 }
 0x2be   :  { %1662 = vmatprep.subr.bf16.mxu1 %v1921_v36 }
 0x2c1   :  { %1663 = vmatpush3.bf16.msra.mxu1 %v1922_v37 }
 0x377   :  { %v1018_v8 = vpop.f32.mrb[4].mxu1 }
 0x378   :  { %v1019_v9 = vadd.f32 %v1018_v8, %v817_v6  ;;  %v1020_v10 = vpop.f32.mrb[5].mxu1 }
 0x379   :  { %v1021_v11 = vadd.f32 %v1020_v10, %v821_v7  ;;  %v1022_v12 = vpop.f32.mrb[6].mxu1 }
 0x37a   :  { %v1025_v13 = vmul.f32 0.5, %v1019_v9  ;;  %v1023_v14 = vpop.f32.mrb[7].mxu1 }
 0x37b   :  { %v1026_v15 = vmul.f32 0.5, %v1021_v11 }
 0x37c   :  { %1931 = vtanh.f32 %v1025_v13 }
 0x37d   :  { %1933 = vtanh.f32 %v1026_v15 }
 0x386   :  { %v1932_v16 = vpop.eup %1931 }
 0x387   :  { %v1934_v17 = vpop.eup %1933  ;;  %v1029_v18 = vadd.f32 1.0, %v1932_v16 }
 0x388   :  { %v1030_v19 = vadd.f32 1.0, %v1934_v17 }
 0x389   :  { %v1031_v20 = vmul.f32 0.5, %v1029_v18 }
 0x38a   :  { %v1032_v21 = vmul.f32 0.5, %v1030_v19 }
 0x38b   :  { %v1033_v23 = vpack.c.bf16 %v1031_v20, %v1031_v20 }
 0x38c   :  { %v1034_v22 = vpack.c.bf16 %v1032_v21, %v1032_v21 }
 0x38e   :  { %1271 = vmatprep.mubr.bf16.mxu0 %v1034_v22 }
 0x38f   :  { %1272 = vmatmul.mubr.bf16.vlgmr.msra.gmra.mrb[4].mxu0 %v1033_v23 }
 0x462   :  { %v1273_v41 = vpop.f32.mrb[4].mxu0 }
 0x463   :  { %v1274_v42 = vadd.f32 %v1273_v41, %v1072_v39  ;;  %v1275_v43 = vpop.f32.mrb[5].mxu0 }
 0x464   :  { %v1276_v44 = vadd.f32 %v1275_v43, %v1076_v40  ;;  %v1277_v45 = vpop.f32.mrb[6].mxu0 }
 0x465   :  { %v1280_v46 = vmul.f32 0.5, %v1274_v42  ;;  %v1278_v47 = vpop.f32.mrb[7].mxu0 }
 0x466   :  { %v1281_v48 = vmul.f32 0.5, %v1276_v44 }
 0x467   :  { %1935 = vtanh.f32 %v1280_v46 }
 0x468   :  { %1937 = vtanh.f32 %v1281_v48 }
 0x471   :  { %v1936_v49 = vpop.eup %1935 }
 0x472   :  { %v1938_v50 = vpop.eup %1937  ;;  %v1284_v51 = vadd.f32 1.0, %v1936_v49 }
 0x473   :  { %v1285_v52 = vadd.f32 1.0, %v1938_v50 }
 0x474   :  { %v1286_v53 = vmul.f32 0.5, %v1284_v51 }
 0x475   :  { %v1287_v54 = vmul.f32 0.5, %v1285_v52 }
 0x476   :  { %v1288_v24 = vpack.c.bf16 %v1286_v53, %v1286_v53 }
 0x477   :  { %v1289_v55 = vpack.c.bf16 %v1287_v54, %v1287_v54 }
 0x479   :  { %1457 = vmatprep.mubr.bf16.mxu1 %v1289_v55 }
 0x47a   :  { %1458 = vmatmul.mubr.bf16.vlgmr.msra.gmra.mrb[8].mxu1 %v1288_v24 }
 0x54d   :  { %v1664_v26 = vpop.f32.mrb[8].mxu1 }
 0x54e   :  { %v1665_v57 = vpop.f32.mrb[9].mxu1 }
 0x54f   :  { %v1666_v58 = vadd.f32 %v1665_v57, %v1664_v26  ;;  %v1667_v59 = vpop.f32.mrb[10].mxu1 }
 0x550   :  { %v1668_v60 = vpop.f32.mrb[11].mxu1 }
 0x551   :  { %v1460_v61 = vadd.f32 %v1666_v58, %v1631_v56 }
 0x553   :  { %1465 = vst [vmem:[#allocation13] sm:$0xff] %v1460_v61 }
 0x554   :  { %2082 = shalt.err (!%p2079_p10)
}
 0x555   :  { %s2083_s10 = scalar_lea.hbm %s2315_s11, 128 }
 0x556   :  { %p2084_p11 = scmp.ne.s32.totalorder %s2315_s11, %s2083_s10  ;;  %p2087_p12 = scmp.lt.u32.totalorder %s2083_s10, %s2315_s11 }
 0x558   :  { %p2089_p13 = pnand %p2087_p12, %p2084_p11 }
 0x55a   :  { %2092 = shalt.err (!%p2089_p13)
}
 0x55b   :  { %1475 = dma.vmem_to_hbm [thread:$0]  %s1473_s19, 128, %s2315_s11, [#allocation4]  }
 0x55c   :  { %2101 = dma.done.wait [#allocation4], 128  }
 0x55d   :  { %2102 = vsyncadd [#allocation4], 4294967168 }
 0x55e   :  { %1479 = vsyncpa [#allocation3], 1 }
 0x55f   :  { %1480 = vsyncpa [#allocation6], 1 }
 0x560   :  { %1481 = vsyncpa [#allocation9], 1 }
 0x561   :  { %1482 = vsyncpa [#allocation12], 1 }
 0x562   :  { %1483 = vsyncpa [#allocation4], 1 }

</bundles_post_ra>
